<compile_context>
chip_gen: v7x
topology: tpu7x:2x2x1
jax: 0.10.0
libtpu: 0.0.40
codegen_flags: <defaults>
</compile_context>

<pallas_src>
import math
from functools import partial

import jax
import jax.numpy as jnp
from jax import lax
from jax.experimental import pallas as pl
from jax.experimental.pallas import tpu as pltpu

VMEM_LIMIT = 32 * 1024 * 1024  # explicit scoped-VMEM limit (safe on v5e/v6e/v7x)


# ----------------------------------------------------------------------------
# Kernels
# ----------------------------------------------------------------------------

def _norm_qkv_rope_kernel(x_ref, nw_ref, wqk_ref, wv_ref, cos_ref, sm_ref,
                          sp_ref, q_ref, k_ref, v_ref, *, eps, q_cols):
    # x: (tq, D); wqk: (D, (Hq+Hkv)*Dh) bf16; wv: (D, Hkv*Dh) bf16
    # cos/sm/sp: (tq, (Hq+Hkv)*Dh) f32 ; q: (tq, Hq*Dh); k/v: (tq, Hkv*Dh)
    x = x_ref[...]
    ms = jnp.mean(x * x, axis=-1, keepdims=True)
    inv = pl.reciprocal(jnp.sqrt(ms) + eps, approx=True)      # EUP slot
    xn = nw_ref[...] * x * inv                                # RMSNorm (ref formula)
    xn_b = xn.astype(wqk_ref.dtype)                           # bf16 MXU LHS
    qk = jnp.dot(xn_b, wqk_ref[...], preferred_element_type=jnp.float32)
    v = jnp.dot(xn_b, wv_ref[...], preferred_element_type=jnp.float32)
    # Interleaved RoPE on Q|K columns only (V untouched):
    #   out[2i]   = x[2i]*c_i - x[2i+1]*s_i
    #   out[2i+1] = x[2i+1]*c_i + x[2i]*s_i
    # roll(T-1) (== roll -1) brings x[2i+1] to even lanes, roll(+1) brings
    # x[2i] to odd lanes; sm = -sin on even lanes, sp = +sin on odd lanes.
    t = qk.shape[-1]
    rot = (qk * cos_ref[...]
           + pltpu.roll(qk, shift=t - 1, axis=1) * sm_ref[...]
           + pltpu.roll(qk, shift=1, axis=1) * sp_ref[...])
    q_ref[...] = rot[:, :q_cols].astype(q_ref.dtype)
    k_ref[...] = rot[:, q_cols:].astype(k_ref.dtype)
    v_ref[...] = v.astype(v_ref.dtype)


def _attn_wo_kernel(q_ref, k_ref, v_ref, wo_ref, res_ref, o_ref, *,
                    n_kv_heads, n_rep, head_dim):
    # q: (tq, Hq*Dh); k/v: (Skv, Hkv*Dh); wo: (Hq*Dh, D) bf16; res/out: (tq, D)
    # NOTE: no causal mask — this matches the reference module (full softmax
    # over the cached length).  1/sqrt(Dh) is folded into wq at weight prep.
    S = q_ref.shape[0]
    D = res_ref.shape[-1]
    q = q_ref[...]
    k = k_ref[...]
    v = v_ref[...]
    acc = jnp.zeros((S, D), jnp.float32)
    for g in range(n_kv_heads):                       # static, small unroll
        kg = k[:, g * head_dim:(g + 1) * head_dim]    # (Skv, Dh)
        vg = v[:, g * head_dim:(g + 1) * head_dim]
        for r in range(n_rep):
            h = g * n_rep + r
            qh = q[:, h * head_dim:(h + 1) * head_dim]            # (tq, Dh)
            s = lax.dot_general(qh, kg, (((1,), (1,)), ((), ())),
                                preferred_element_type=jnp.float32)
            m = jnp.max(s, axis=-1, keepdims=True)
            p = jnp.exp(s - m)
            l = jnp.sum(p, axis=-1, keepdims=True)
            p = p * pl.reciprocal(l, approx=True)
            oh = jnp.dot(p.astype(v.dtype), vg,
                         preferred_element_type=jnp.float32)      # (tq, Dh)
            wo_h = wo_ref[h * head_dim:(h + 1) * head_dim, :]     # (Dh, D) bf16
            acc = acc + jnp.dot(oh.astype(wo_ref.dtype), wo_h,
                                preferred_element_type=jnp.float32)
    o_ref[...] = (res_ref[...] + acc).astype(o_ref.dtype)


def _norm_ffn_kernel(h_ref, nw_ref, w1_ref, w3_ref, w2_ref, o_ref, *, eps):
    # h: (tn, D); w1/w3: (D, H) bf16; w2: (H, D) bf16; out: (tn, D)
    x = h_ref[...]
    ms = jnp.mean(x * x, axis=-1, keepdims=True)
    inv = pl.reciprocal(jnp.sqrt(ms) + eps, approx=True)
    xn = (nw_ref[...] * x * inv).astype(w1_ref.dtype)            # bf16 MXU LHS
    gate = jnp.dot(xn, w1_ref[...], preferred_element_type=jnp.float32)
    up = jnp.dot(xn, w3_ref[...], preferred_element_type=jnp.float32)
    g = (jax.nn.silu(gate) * up).astype(w2_ref.dtype)            # SwiGLU, bf16
    y = jnp.dot(g, w2_ref[...], preferred_element_type=jnp.float32)
    o_ref[...] = (x + y).astype(o_ref.dtype)                     # residual


# ----------------------------------------------------------------------------
# Tiling helper
# ----------------------------------------------------------------------------

def _pick_tile(n, candidates=(512, 256, 128, 64, 32, 16, 8)):
    # Largest multiple-of-8 tile that still yields >1 grid step when possible.
    for t in candidates:
        if t < n and n % t == 0:
            return t
    return n


# ----------------------------------------------------------------------------
# pallas_call wrappers
# ----------------------------------------------------------------------------

def fused_norm_qkv_rope(x, prep, eps):
    B, S, D = x.shape
    Tqk = prep["wqk"].shape[1]
    Tv = prep["wv"].shape[1]
    q_cols = Tqk - Tv                                  # Hq * Dh
    tq = _pick_tile(S)
    return pl.pallas_call(
        partial(_norm_qkv_rope_kernel, eps=eps, q_cols=q_cols),
        out_shape=(jax.ShapeDtypeStruct((B, S, q_cols), x.dtype),
                   jax.ShapeDtypeStruct((B, S, Tv), x.dtype),
                   jax.ShapeDtypeStruct((B, S, Tv), x.dtype)),
        grid=(B, S // tq),
        in_specs=[
            pl.BlockSpec((None, tq, D), lambda b, s: (b, s, 0)),
            pl.BlockSpec((1, D), lambda b, s: (0, 0)),
            pl.BlockSpec((D, Tqk), lambda b, s: (0, 0)),
            pl.BlockSpec((D, Tv), lambda b, s: (0, 0)),
            pl.BlockSpec((tq, Tqk), lambda b, s: (s, 0)),
            pl.BlockSpec((tq, Tqk), lambda b, s: (s, 0)),
            pl.BlockSpec((tq, Tqk), lambda b, s: (s, 0)),
        ],
        out_specs=(
            pl.BlockSpec((None, tq, q_cols), lambda b, s: (b, s, 0)),
            pl.BlockSpec((None, tq, Tv), lambda b, s: (b, s, 0)),
            pl.BlockSpec((None, tq, Tv), lambda b, s: (b, s, 0)),
        ),
        compiler_params=pltpu.CompilerParams(
            dimension_semantics=("parallel", "parallel"),
            vmem_limit_bytes=VMEM_LIMIT),
    )(x, prep["attn_norm_w"], prep["wqk"], prep["wv"],
      prep["cos"], prep["sm"], prep["sp"])


def fused_attn_wo(q, keys, vals, wo, res, n_kv_heads, n_rep, head_dim):
    B, S, Dq = q.shape
    _, Skv, Dkv = keys.shape
    D = wo.shape[1]
    tq = _pick_tile(S)
    return pl.pallas_call(
        partial(_attn_wo_kernel, n_kv_heads=n_kv_heads, n_rep=n_rep,
                head_dim=head_dim),
        out_shape=jax.ShapeDtypeStruct((B, S, D), res.dtype),
        grid=(B, S // tq),
        in_specs=[
            pl.BlockSpec((None, tq, Dq), lambda b, s: (b, s, 0)),
            pl.BlockSpec((None, Skv, Dkv), lambda b, s: (b, 0, 0)),
            pl.BlockSpec((None, Skv, Dkv), lambda b, s: (b, 0, 0)),
            pl.BlockSpec((Dq, D), lambda b, s: (0, 0)),
            pl.BlockSpec((None, tq, D), lambda b, s: (b, s, 0)),
        ],
        out_specs=pl.BlockSpec((None, tq, D), lambda b, s: (b, s, 0)),
        compiler_params=pltpu.CompilerParams(
            dimension_semantics=("parallel", "parallel"),
            vmem_limit_bytes=VMEM_LIMIT),
    )(q, keys, vals, wo, res)


def fused_norm_ffn(h2d, norm_w, w1, w3, w2, eps):
    N, D = h2d.shape
    H = w1.shape[1]
    tn = _pick_tile(N)
    return pl.pallas_call(
        partial(_norm_ffn_kernel, eps=eps),
        out_shape=jax.ShapeDtypeStruct((N, D), h2d.dtype),
        grid=(N // tn,),
        in_specs=[
            pl.BlockSpec((tn, D), lambda i: (i, 0)),
            pl.BlockSpec((1, D), lambda i: (0, 0)),
            pl.BlockSpec((D, H), lambda i: (0, 0)),
            pl.BlockSpec((D, H), lambda i: (0, 0)),
            pl.BlockSpec((H, D), lambda i: (0, 0)),
        ],
        out_specs=pl.BlockSpec((tn, D), lambda i: (i, 0)),
        compiler_params=pltpu.CompilerParams(
            dimension_semantics=("parallel",),
            vmem_limit_bytes=VMEM_LIMIT),
    )(h2d, norm_w, w1, w3, w2)


# ----------------------------------------------------------------------------
# One-time setup: weight concat/fold/cast + RoPE tables (hoisted out of forward)
# ----------------------------------------------------------------------------

def _rope_tables(cos, sin, n_qk_heads, head_dim):
    # Tables cover only the Q|K column span: (S, (Hq+Hkv)*Dh)
    c2 = jnp.repeat(cos, 2, axis=-1)              # (S, Dh): c_i at lanes 2i,2i+1
    s2 = jnp.repeat(sin, 2, axis=-1)
    even = (jnp.arange(head_dim) % 2) == 0
    sm = jnp.where(even, -s2, 0.0)                # -sin on even lanes
    sp = jnp.where(even, 0.0, s2)                 # +sin on odd lanes
    return (jnp.tile(c2, (1, n_qk_heads)),
            jnp.tile(sm, (1, n_qk_heads)),
            jnp.tile(sp, (1, n_qk_heads)))


def prepare_block(params, freqs_cos, freqs_sin, n_heads, n_kv_heads, head_dim,
                  compute_dtype=jnp.bfloat16):
    D = params["wq"].shape[0]
    scale = 1.0 / math.sqrt(head_dim)             # fold 1/sqrt(Dh) into wq
    wqk = jnp.concatenate([params["wq"] * scale, params["wk"]],
                          axis=1).astype(compute_dtype)
    cos_f, sin_m, sin_p = _rope_tables(freqs_cos, freqs_sin,
                                       n_heads + n_kv_heads, head_dim)
    return dict(
        attn_norm_w=params["attn_norm_w"].reshape(1, D),
        ffn_norm_w=params["ffn_norm_w"].reshape(1, D),
        wqk=wqk,
        wv=params["wv"].astype(compute_dtype),
        wo=params["wo"].astype(compute_dtype),
        w1=params["w1"].astype(compute_dtype),
        w3=params["w3"].astype(compute_dtype),
        w2=params["w2"].astype(compute_dtype),
        cos=cos_f, sm=sin_m, sp=sin_p,
    )


# ----------------------------------------------------------------------------
# EncoderBlock forward (glue: cache bookkeeping, free reshapes)
# ----------------------------------------------------------------------------

def encoder_block_forward(prep, x, start_pos, cache_k, cache_v,
                          n_heads, n_kv_heads, eps):
    B, S, D = x.shape
    head_dim = D // n_heads
    n_rep = n_heads // n_kv_heads

    # --- K1: RMSNorm + Q|K projection + RoPE, V projection
    q, k, v = fused_norm_qkv_rope(x, prep, eps)
    k4 = k.reshape(B, S, n_kv_heads, head_dim)
    v4 = v.reshape(B, S, n_kv_heads, head_dim)

    # KV-cache write + read (zero-initialized cache, matching torch buffers).
    # start_pos is a static Python int here, as in the reference.
    # TODO(synk): write K/V into the cache directly from K1 (input_output_aliases)
    cache_k = lax.dynamic_update_slice(cache_k, k4, (0, start_pos, 0, 0))
    cache_v = lax.dynamic_update_slice(cache_v, v4, (0, start_pos, 0, 0))
    skv = start_pos + S
    keys = cache_k[:B, :skv].reshape(B, skv, n_kv_heads * head_dim)
    vals = cache_v[:B, :skv].reshape(B, skv, n_kv_heads * head_dim)

    # --- K2: GQA attention + wo (per-head accumulation) + residual
    h = fused_attn_wo(q, keys, vals, prep["wo"], x, n_kv_heads, n_rep, head_dim)

    # --- K3: RMSNorm + SwiGLU FFN + residual
    out2d = fused_norm_ffn(h.reshape(B * S, D), prep["ffn_norm_w"],
                           prep["w1"], prep["w3"], prep["w2"], eps)
    return out2d.reshape(B, S, D)


# ----------------------------------------------------------------------------
# Parameter / input construction + pure-JAX reference
# ----------------------------------------------------------------------------

def init_params(key, dim, n_heads, n_kv_heads, hidden_dim):
    head_dim = dim // n_heads
    ks = jax.random.split(key, 9)
    sc = 0.02
    f32 = jnp.float32
    return dict(
        attn_norm_w=1.0 + 0.1 * jax.random.normal(ks[0], (dim,), f32),
        ffn_norm_w=1.0 + 0.1 * jax.random.normal(ks[1], (dim,), f32),
        wq=sc * jax.random.normal(ks[2], (dim, n_heads * head_dim), f32),
        wk=sc * jax.random.normal(ks[3], (dim, n_kv_heads * head_dim), f32),
        wv=sc * jax.random.normal(ks[4], (dim, n_kv_heads * head_dim), f32),
        wo=sc * jax.random.normal(ks[5], (n_heads * head_dim, dim), f32),
        w1=sc * jax.random.normal(ks[6], (dim, hidden_dim), f32),
        w3=sc * jax.random.normal(ks[7], (dim, hidden_dim), f32),
        w2=sc * jax.random.normal(ks[8], (hidden_dim, dim), f32),
    )


def precompute_freqs(head_dim, seq_len, theta=10000.0):
    inv = 1.0 / (theta ** (jnp.arange(0, head_dim, 2, dtype=jnp.float32) / head_dim))
    t = jnp.arange(seq_len, dtype=jnp.float32)
    ang = jnp.outer(t, inv)                 # (S, head_dim//2)
    return jnp.cos(ang), jnp.sin(ang)


def _rope_ref(x, cos, sin):
    B, S, H, Dh = x.shape
    xp = x.reshape(B, S, H, Dh // 2, 2)
    xr, xi = xp[..., 0], xp[..., 1]
    c = cos[None, :, None, :]
    s = sin[None, :, None, :]
    return jnp.stack([xr * c - xi * s, xr * s + xi * c], axis=-1).reshape(B, S, H, Dh)


def reference_forward(params, x, start_pos, cos, sin, cache_k, cache_v,
                      n_heads, n_kv_heads, eps):
    B, S, D = x.shape
    head_dim = D // n_heads
    n_rep = n_heads // n_kv_heads

    def rms(v, w):
        return w * v / (jnp.sqrt(jnp.mean(v * v, axis=-1, keepdims=True)) + eps)

    xn = rms(x, params["attn_norm_w"])
    q = (xn @ params["wq"]).reshape(B, S, n_heads, head_dim)
    k = (xn @ params["wk"]).reshape(B, S, n_kv_heads, head_dim)
    v = (xn @ params["wv"]).reshape(B, S, n_kv_heads, head_dim)
    q = _rope_ref(q, cos, sin)
    k = _rope_ref(k, cos, sin)
    cache_k = lax.dynamic_update_slice(cache_k, k, (0, start_pos, 0, 0))
    cache_v = lax.dynamic_update_slice(cache_v, v, (0, start_pos, 0, 0))
    keys = jnp.repeat(cache_k[:B, :start_pos + S], n_rep, axis=2)
    vals = jnp.repeat(cache_v[:B, :start_pos + S], n_rep, axis=2)
    qh = q.transpose(0, 2, 1, 3)
    kh = keys.transpose(0, 2, 3, 1)
    vh = vals.transpose(0, 2, 1, 3)
    scores = jnp.matmul(qh, kh) / math.sqrt(head_dim)
    attn = jax.nn.softmax(scores, axis=-1)
    out = jnp.matmul(attn, vh).transpose(0, 2, 1, 3).reshape(B, S, D)
    h = x + out @ params["wo"]
    hn = rms(h, params["ffn_norm_w"])
    gate = jax.nn.silu(hn @ params["w1"]) * (hn @ params["w3"])
    return h + gate @ params["w2"]


# ----------------------------------------------------------------------------

if __name__ == "__main__":
    # Small ModelArgs-consistent config (GQA, n_rep=3). head_dim chosen so
    # (Hq+Hkv)*Dh = 128 (lane-dense RoPE span) and sqrt(Dh) is a power of two
    # (exact scale fold).
    B, S = 2, 16
    n_heads, n_kv_heads = 6, 2
    head_dim = 16
    D = n_heads * head_dim                                   # 96
    multiple_of = 32
    hidden_dim = math.ceil(int(D * 8 / 3) / multiple_of) * multiple_of   # 256
    max_batch, max_seq = 4, 32
    eps = 1e-5
    start_pos = 0

    key = jax.random.PRNGKey(0)
    kx, kp = jax.random.split(key)
    x = jax.random.normal(kx, (B, S, D), jnp.float32)
    params = init_params(kp, D, n_heads, n_kv_heads, hidden_dim)
    # Round projection weights to bf16 once so the bf16-streaming kernels and
    # the f32 reference share the same weight quantization.
    for name in ("wq", "wk", "wv", "wo", "w1", "w3", "w2"):
        params[name] = params[name].astype(jnp.bfloat16).astype(jnp.float32)

    freqs_cos, freqs_sin = precompute_freqs(head_dim, S)
    cache_k = jnp.zeros((max_batch, max_seq, n_kv_heads, head_dim), jnp.float32)
    cache_v = jnp.zeros((max_batch, max_seq, n_kv_heads, head_dim), jnp.float32)

    # One-time setup (weight concat / scale fold / bf16 cast / RoPE tables)
    prep = prepare_block(params, freqs_cos, freqs_sin,
                         n_heads, n_kv_heads, head_dim)

    out = encoder_block_forward(prep, x, start_pos, cache_k, cache_v,
                                n_heads, n_kv_heads, eps)
    out = jax.block_until_ready(out)

    ref = reference_forward(params, x, start_pos, freqs_cos, freqs_sin,
                            cache_k, cache_v, n_heads, n_kv_heads, eps)
    ref = jax.block_until_ready(ref)

    assert out.shape == (B, S, D)
    assert bool(jnp.all(jnp.isfinite(out)))
    max_err = float(jnp.max(jnp.abs(out - ref)))
    assert max_err < 2e-2, f"mismatch vs reference: max abs err {max_err}"
    print("KERNEL_OK")
</pallas_src>

<mosaic_0001>
module attributes {stable_mosaic.version = 11 : i64} {
  func.func @_norm_qkv_rope_kernel(%arg0: i32, %arg1: i32, %arg2: memref<1x8x96xf32, #tpu.memory_space<vmem>>, %arg3: memref<1x96xf32, #tpu.memory_space<vmem>>, %arg4: memref<96x128xbf16, #tpu.memory_space<vmem>>, %arg5: memref<96x32xbf16, #tpu.memory_space<vmem>>, %arg6: memref<8x128xf32, #tpu.memory_space<vmem>>, %arg7: memref<8x128xf32, #tpu.memory_space<vmem>>, %arg8: memref<8x128xf32, #tpu.memory_space<vmem>>, %arg9: memref<1x8x96xf32, #tpu.memory_space<vmem>>, %arg10: memref<1x8x32xf32, #tpu.memory_space<vmem>>, %arg11: memref<1x8x32xf32, #tpu.memory_space<vmem>>) attributes {dimension_semantics = [#tpu.dimension_semantics<parallel>, #tpu.dimension_semantics<parallel>], iteration_bounds = array<i64: 2, 2>, scalar_prefetch = 0 : i64, scratch_operands = 0 : i64, tpu.core_type = #tpu.core_type<tc>, window_params = [{transform_indices = @transform_0, window_bounds = array<i64: 1, 8, 96>}, {pipeline_mode = #tpu.pipeline_mode<synchronous>, transform_indices = @transform_1, window_bounds = array<i64: 1, 96>}, {pipeline_mode = #tpu.pipeline_mode<synchronous>, transform_indices = @transform_2, window_bounds = array<i64: 96, 128>}, {pipeline_mode = #tpu.pipeline_mode<synchronous>, transform_indices = @transform_3, window_bounds = array<i64: 96, 32>}, {transform_indices = @transform_4, window_bounds = array<i64: 8, 128>}, {transform_indices = @transform_5, window_bounds = array<i64: 8, 128>}, {transform_indices = @transform_6, window_bounds = array<i64: 8, 128>}, {transform_indices = @transform_7, window_bounds = array<i64: 1, 8, 96>}, {transform_indices = @transform_8, window_bounds = array<i64: 1, 8, 32>}, {transform_indices = @transform_9, window_bounds = array<i64: 1, 8, 32>}]} {
    %c0 = arith.constant 0 : index
    %c0_0 = arith.constant 0 : index
    %c0_1 = arith.constant 0 : index
    %0 = vector.load %arg2[%c0, %c0_0, %c0_1] : memref<1x8x96xf32, #tpu.memory_space<vmem>>, vector<1x8x96xf32>
    %1 = vector.shape_cast %0 : vector<1x8x96xf32> to vector<8x96xf32>
    %2 = arith.mulf %1, %1 : vector<8x96xf32>
    %cst = arith.constant dense<0.000000e+00> : vector<8xf32>
    %3 = vector.multi_reduction <add>, %2, %cst [1] : vector<8x96xf32> to vector<8xf32>
    %4 = vector.shape_cast %3 : vector<8xf32> to vector<8x1xf32>
    %cst_2 = arith.constant 9.600000e+01 : f32
    %5 = vector.broadcast %cst_2 : f32 to vector<8x1xf32>
    %6 = arith.divf %4, %5 : vector<8x1xf32>
    %7 = math.sqrt %6 : vector<8x1xf32>
    %cst_3 = arith.constant 9.99999974E-6 : f32
    %8 = vector.broadcast %cst_3 : f32 to vector<8x1xf32>
    %9 = arith.addf %7, %8 : vector<8x1xf32>
    %10 = tpu.reciprocal %9 {approx = true} : vector<8x1xf32> -> vector<8x1xf32>
    %c0_4 = arith.constant 0 : index
    %c0_5 = arith.constant 0 : index
    %11 = vector.load %arg3[%c0_4, %c0_5] : memref<1x96xf32, #tpu.memory_space<vmem>>, vector<1x96xf32>
    %12 = vector.broadcast %11 : vector<1x96xf32> to vector<8x96xf32>
    %13 = arith.mulf %12, %1 : vector<8x96xf32>
    %14 = vector.broadcast %10 : vector<8x1xf32> to vector<8x96xf32>
    %15 = arith.mulf %13, %14 : vector<8x96xf32>
    %16 = arith.truncf %15 : vector<8x96xf32> to vector<8x96xbf16>
    %c0_6 = arith.constant 0 : index
    %c0_7 = arith.constant 0 : index
    %17 = vector.load %arg4[%c0_6, %c0_7] : memref<96x128xbf16, #tpu.memory_space<vmem>>, vector<96x128xbf16>
    %cst_8 = arith.constant dense<0.000000e+00> : vector<8x128xf32>
    %18 = tpu.matmul %16, %17, %cst_8 {dimension_numbers = #tpu.dot_dimension_numbers<[1], [0], [0], [1], [0, 0, 1, 1], [], []>} : vector<8x96xbf16>, vector<96x128xbf16>, vector<8x128xf32> -> vector<8x128xf32>
    %c0_9 = arith.constant 0 : index
    %c0_10 = arith.constant 0 : index
    %19 = vector.load %arg5[%c0_9, %c0_10] : memref<96x32xbf16, #tpu.memory_space<vmem>>, vector<96x32xbf16>
    %cst_11 = arith.constant dense<0.000000e+00> : vector<8x32xf32>
    %20 = tpu.matmul %16, %19, %cst_11 {dimension_numbers = #tpu.dot_dimension_numbers<[1], [0], [0], [1], [0, 0, 1, 1], [], []>} : vector<8x96xbf16>, vector<96x32xbf16>, vector<8x32xf32> -> vector<8x32xf32>
    %c0_12 = arith.constant 0 : index
    %c0_13 = arith.constant 0 : index
    %21 = vector.load %arg6[%c0_12, %c0_13] : memref<8x128xf32, #tpu.memory_space<vmem>>, vector<8x128xf32>
    %22 = arith.mulf %18, %21 : vector<8x128xf32>
    %c127_i32 = arith.constant 127 : i32
    %23 = tpu.dynamic_rotate %18 by %c127_i32 dim 1 : vector<8x128xf32>, i32 -> vector<8x128xf32>
    %c0_14 = arith.constant 0 : index
    %c0_15 = arith.constant 0 : index
    %24 = vector.load %arg7[%c0_14, %c0_15] : memref<8x128xf32, #tpu.memory_space<vmem>>, vector<8x128xf32>
    %25 = arith.mulf %23, %24 : vector<8x128xf32>
    %26 = arith.addf %22, %25 : vector<8x128xf32>
    %c1_i32 = arith.constant 1 : i32
    %27 = tpu.dynamic_rotate %18 by %c1_i32 dim 1 : vector<8x128xf32>, i32 -> vector<8x128xf32>
    %c0_16 = arith.constant 0 : index
    %c0_17 = arith.constant 0 : index
    %28 = vector.load %arg8[%c0_16, %c0_17] : memref<8x128xf32, #tpu.memory_space<vmem>>, vector<8x128xf32>
    %29 = arith.mulf %27, %28 : vector<8x128xf32>
    %30 = arith.addf %26, %29 : vector<8x128xf32>
    %31 = vector.extract_strided_slice %30 {offsets = [0, 0], sizes = [8, 96], strides = [1, 1]} : vector<8x128xf32> to vector<8x96xf32>
    %c0_18 = arith.constant 0 : index
    %c0_19 = arith.constant 0 : index
    %c0_20 = arith.constant 0 : index
    %32 = vector.load %arg9[%c0_18, %c0_19, %c0_20] : memref<1x8x96xf32, #tpu.memory_space<vmem>>, vector<1x8x96xf32>
    %33 = vector.shape_cast %32 : vector<1x8x96xf32> to vector<8x96xf32>
    %34 = vector.shape_cast %31 : vector<8x96xf32> to vector<1x8x96xf32>
    tpu.vector_store %arg9[%c0_18, %c0_19, %c0_20], %34 {strides = array<i32>} : memref<1x8x96xf32, #tpu.memory_space<vmem>>, vector<1x8x96xf32>,
    %35 = vector.extract_strided_slice %30 {offsets = [0, 96], sizes = [8, 32], strides = [1, 1]} : vector<8x128xf32> to vector<8x32xf32>
    %c0_21 = arith.constant 0 : index
    %c0_22 = arith.constant 0 : index
    %c0_23 = arith.constant 0 : index
    %36 = vector.load %arg10[%c0_21, %c0_22, %c0_23] : memref<1x8x32xf32, #tpu.memory_space<vmem>>, vector<1x8x32xf32>
    %37 = vector.shape_cast %36 : vector<1x8x32xf32> to vector<8x32xf32>
    %38 = vector.shape_cast %35 : vector<8x32xf32> to vector<1x8x32xf32>
    tpu.vector_store %arg10[%c0_21, %c0_22, %c0_23], %38 {strides = array<i32>} : memref<1x8x32xf32, #tpu.memory_space<vmem>>, vector<1x8x32xf32>,
    %c0_24 = arith.constant 0 : index
    %c0_25 = arith.constant 0 : index
    %c0_26 = arith.constant 0 : index
    %39 = vector.load %arg11[%c0_24, %c0_25, %c0_26] : memref<1x8x32xf32, #tpu.memory_space<vmem>>, vector<1x8x32xf32>
    %40 = vector.shape_cast %39 : vector<1x8x32xf32> to vector<8x32xf32>
    %41 = vector.shape_cast %20 : vector<8x32xf32> to vector<1x8x32xf32>
    tpu.vector_store %arg11[%c0_24, %c0_25, %c0_26], %41 {strides = array<i32>} : memref<1x8x32xf32, #tpu.memory_space<vmem>>, vector<1x8x32xf32>,
    return
  }
  func.func @transform_0(%arg0: i32, %arg1: i32) -> (i32, i32, i32) {
    %c0_i32 = arith.constant 0 : i32
    %c0_i32_0 = arith.constant 0 : i32
    return %arg0, %arg1, %c0_i32 : i32, i32, i32
  }
  func.func @transform_1(%arg0: i32, %arg1: i32) -> (i32, i32) {
    %c0_i32 = arith.constant 0 : i32
    %c0_i32_0 = arith.constant 0 : i32
    %c0_i32_1 = arith.constant 0 : i32
    return %c0_i32, %c0_i32_0 : i32, i32
  }
  func.func @transform_2(%arg0: i32, %arg1: i32) -> (i32, i32) {
    %c0_i32 = arith.constant 0 : i32
    %c0_i32_0 = arith.constant 0 : i32
    %c0_i32_1 = arith.constant 0 : i32
    return %c0_i32, %c0_i32_0 : i32, i32
  }
  func.func @transform_3(%arg0: i32, %arg1: i32) -> (i32, i32) {
    %c0_i32 = arith.constant 0 : i32
    %c0_i32_0 = arith.constant 0 : i32
    %c0_i32_1 = arith.constant 0 : i32
    return %c0_i32, %c0_i32_0 : i32, i32
  }
  func.func @transform_4(%arg0: i32, %arg1: i32) -> (i32, i32) {
    %c0_i32 = arith.constant 0 : i32
    %c0_i32_0 = arith.constant 0 : i32
    return %arg1, %c0_i32 : i32, i32
  }
  func.func @transform_5(%arg0: i32, %arg1: i32) -> (i32, i32) {
    %c0_i32 = arith.constant 0 : i32
    %c0_i32_0 = arith.constant 0 : i32
    return %arg1, %c0_i32 : i32, i32
  }
  func.func @transform_6(%arg0: i32, %arg1: i32) -> (i32, i32) {
    %c0_i32 = arith.constant 0 : i32
    %c0_i32_0 = arith.constant 0 : i32
    return %arg1, %c0_i32 : i32, i32
  }
  func.func @transform_7(%arg0: i32, %arg1: i32) -> (i32, i32, i32) {
    %c0_i32 = arith.constant 0 : i32
    %c0_i32_0 = arith.constant 0 : i32
    return %arg0, %arg1, %c0_i32 : i32, i32, i32
  }
  func.func @transform_8(%arg0: i32, %arg1: i32) -> (i32, i32, i32) {
    %c0_i32 = arith.constant 0 : i32
    %c0_i32_0 = arith.constant 0 : i32
    return %arg0, %arg1, %c0_i32 : i32, i32, i32
  }
  func.func @transform_9(%arg0: i32, %arg1: i32) -> (i32, i32, i32) {
    %c0_i32 = arith.constant 0 : i32
    %c0_i32_0 = arith.constant 0 : i32
    return %arg0, %arg1, %c0_i32 : i32, i32, i32
  }
}

</mosaic_0001>

<bundles_post_ra>
// kernel: tpu_custom_call.1
= control target key start
LH: loop header
LB: loop body
LE: loop exit
PB: predicated region body
PF: predicated region fallthrough
CT: control target
= control target key end

     0   :  { %s1919_s0 = inlined_call_operand.hbm [shape: f32[2,16,96], index: 0, kind: input, shape index: {}]   ;;  %s1920_s1 = inlined_call_operand.vmem [shape: f32[1,96], index: 1, kind: input, shape index: {}]   ;;  %s1921_s2 = inlined_call_operand.vmem [shape: bf16[96,128], index: 2, kind: input, shape index: {}]   ;;  %s1922_s3 = inlined_call_operand.vmem [shape: bf16[96,32], index: 3, kind: input, shape index: {}]   ;;  %s1923_s4 = inlined_call_operand.vmem [shape: f32[16,128], index: 4, kind: input, shape index: {}]   ;;  %s1924_s5 = inlined_call_operand.vmem [shape: f32[16,128], index: 5, kind: input, shape index: {}]   ;;  %s1925_s6 = inlined_call_operand.hbm [shape: f32[16,128], index: 6, kind: input, shape index: {}]   ;;  %s1926_s7 = inlined_call_operand.hbm [shape: f32[2,16,96], index: 7, kind: output, shape index: {0}]   ;;  %s1927_s8 = inlined_call_operand.hbm [shape: f32[2,16,32], index: 8, kind: output, shape index: {1}]   ;;  %s1928_s9 = inlined_call_operand.hbm [shape: f32[2,16,32], index: 9, kind: output, shape index: {2}]  }
   0x1   :  { %1947 = sst [smem:[#allocation21_spill]] %s1919_s0 }
   0x2   :  { %1948 = sst [smem:[#allocation22_spill]] %s1920_s1 }
   0x3   :  { %1949 = sst [smem:[#allocation23_spill]] %s1921_s2 }
   0x4   :  { %1950 = sst [smem:[#allocation24_spill]] %s1922_s3 }
   0x5   :  { %1951 = sst [smem:[#allocation25_spill]] %s1923_s4 }
   0x6   :  { %1952 = sst [smem:[#allocation26_spill]] %s1924_s5 }
   0x7   :  { %1953 = sst [smem:[#allocation27_spill]] %s1926_s7 }
   0x8   :  { %1954 = sst [smem:[#allocation28_spill]] %s1927_s8 }
   0x9   :  { %1955 = sst [smem:[#allocation29_spill]] %s1928_s9 }
   0xa   :  { %15 = vsyncpa [#allocation3], 0 }
   0xb   :  { %17 = vsyncpa [#allocation3 + $0x1], 0 }
   0xc   :  { %18 = vsyncpa [#allocation6], 0 }
   0xd   :  { %20 = vsyncpa [#allocation6 + $0x1], 0 }
   0xe   :  { %21 = vsyncpa [#allocation4], 0 }
   0xf   :  { %23 = vsyncpa [#allocation4 + $0x1], 0 }
  0x10   :  { %24 = vsyncpa [#allocation9], 0 }
  0x11   :  { %26 = vsyncpa [#allocation9 + $0x1], 0  ;;  %s1474_s30 = smov 0   ;;  %s1476_s10 = smov 0  }
  0x12   :  { %s1478_s11 = smov 0   ;;  %s1480_s12 = smov 0  }
  0x13   :  { %s1482_s13 = smov 0   ;;  %s1484_s14 = smov 0  }
  0x14   :  { %s1486_s15 = smov 0   ;;  %s1488_s16 = smov 0  }
  0x15   :  { %s1490_s17 = smov 0   ;;  %s1492_s18 = smov 0  }
  0x16   :  { %s1494_s19 = smov 0  }
  0x17 LB: > { %1956 = sst [smem:[#allocation15_spill]] %s1384_s12  ;;  %s1530_s20 = sadd.s32 4294967295, %s1412_s19   ;;  %s1412_s19 = sphi %s1494_s19, %s32_s19   ;;  %s1408_s18 = sphi %s1492_s18, %s2008_s18   ;;  %s1404_s17 = sphi %s1490_s17, %s2007_s17   ;;  %s1400_s16 = sphi %s1488_s16, %s2006_s16   ;;  %s1396_s15 = sphi %s1486_s15, %s2005_s15   ;;  %s1392_s14 = sphi %s1484_s14, %s2004_s14   ;;  %s1388_s13 = sphi %s1482_s13, %s2003_s13   ;;  %s1384_s12 = sphi %s1480_s12, %s2002_s12   ;;  %s1380_s11 = sphi %s1478_s11, %s2001_s11   ;;  %s1376_s10 = sphi %s1476_s10, %s2000_s10   ;;  %s1372_s30 = sphi %s1474_s30, %s1999_s30  }
  0x18   : > { %1957 = sst [smem:[#allocation16_spill]] %s1396_s15  ;;  %s1933_s21 = sadd.s32 4294967294, %s1412_s19  }
  0x19   : > { %1958 = sst [smem:[#allocation17_spill]] %s1400_s16  ;;  %s41_s22 = sadd.s32 1, %s1404_s17 }
  0x1a   : > { %s44_s23 = sadd.s32 1, %s1408_s18  ;;  %p42_p0 = scmp.ge.s32.totalorder %s41_s22, 2 }
  0x1b   : > { %s53_s24 = sadd.s32 1, %s1392_s14  ;;  %p60_p1 = scmp.ne.s32.totalorder %s1392_s14, %s1388_s13 }
  0x1c   : > { %p1941_p2 = scmp.eq.s32.totalorder %s1412_s19, 0  ;;  %s2010_s22 = smov (%p42_p0, %s41_s22), 0 }
  0x1d   : > { %1959 = sst [smem:[#allocation18_spill]] %s2010_s22  ;;  %s2012_s23 = smov (!%p42_p0, %s44_s23), %s1408_s18 }
  0x1e   : > { %s1544_s25 = ssub.s32 %s1404_s17, %s2010_s22  ;;  %p1551_p3 = por %p1941_p2, %p60_p1 }
  0x1f   : > { %p46_p4 = scmp.ge.s32.totalorder %s2012_s23, 2  ;;  %p66_p5 = scmp.ne.s32.totalorder %s1388_s13, %s1384_s12 }
  0x20   : > { %p1939_p6 = scmp.eq.s32.totalorder %s1530_s20, 0  ;;  %p233_p9 = scmp.eq.s32.totalorder %s1530_s20, 3 }
  0x21   : > { %s2014_s23 = smov (%p46_p4, %s2012_s23), 0  ;;  %p239_p10 = scmp.eq.s32.totalorder %s1933_s21, 3 }
  0x22   : > { %1961 = sst [smem:[#allocation19_spill]] %s2014_s23  ;;  %p1563_p8 = por %p1939_p6, %p66_p5 }
  0x23   : > { %s48_s28 = ssub.s32 %s1408_s18, %s2014_s23  ;;  %p1576_p11 = por %p233_p9, %p60_p1 }
  0x24   : > { %s1962_s27 = scalar_select %p1563_p8, 1, 0 }
  0x25   : > { %s50_s29 = sor.u32 %s1544_s25, %s48_s28  ;;  %p1580_p13 = por %p239_p10, %p66_p5 }
  0x26   : > { %s1963_s22 = scalar_select %p1576_p11, 1, 0 }
  0x27   : > { %p51_p12 = scmp.eq.s32.totalorder %s50_s29, 0  ;;  %p1940_p0 = scmp.lt.s32.totalorder %s1412_s19, 4 }
  0x28   : > { %1964 = sst [smem:[#allocation20_spill]] %s1963_s22  ;;  %s324_s23 = sand.u32 1, %s1392_s14  }
  0x29   : > { %s1965_s12 = scalar_select %p1580_p13, 1, 0 }
  0x2a   : > { %s1586_s9 = scalar_select %p51_p12, %s1392_s14, %s53_s24  }
  0x2b   : > { %s944_s21 = sshll.u32 %s1408_s18, 1  ;;  %s943_s8 = sshll.u32 %s324_s23, 3 }
  0x2c   : > { %s333_s7 = sadd.s32 %s1404_s17, %s944_s21  ;;  %s328_s5 = scalar_lea.vmem [#allocation2], %s943_s8 }
  0x2d   : > { %s945_s28 = sshll.u32 %s333_s7, 7  ;;  %s337_s4 = sshll.u32 %s328_s5, 4  ;;  %s1596_s4 = int_to_ptr.vmem [resolvable:$true] %s337_s4 }
  0x2e   : > { %s1966_s0 = sld [smem:[#allocation21_spill]]  ;;  %p1602_p1 = pnand %p1940_p0, %p1551_p3 }
  0x2f   : > { %s325_s5 = scalar_lea.sflag [#allocation3], %s324_s23 }
  0x30   : > { %p1168_p10 = pneg %p1602_p1 }
  0x34   : > { %s1594_s22 = scalar_lea.hbm %s1966_s0, %s945_s28  ;;  %s1171_s16 = scalar_lea.hbm %s1966_s0, 512 }
  0x35   : > { %s1166_s7 = scalar_lea.hbm %s1594_s22, 128  ;;  %p1172_p3 = scmp.lt.u32.totalorder %s1594_s22, %s1966_s0 }
  0x36   : > { %p1167_p9 = scmp.ne.s32.totalorder %s1594_s22, %s1166_s7  ;;  %p1173_p0 = scmp.lt.u32.totalorder %s1171_s16, %s1166_s7 }
  0x37   : > { %p1175_p7 = scmp.lt.u32.totalorder %s1166_s7, %s1594_s22 }
  0x38   : > { %p1169_p12 = pnand %p1168_p10, %p1167_p9  ;;  %p1174_p2 = por %p1173_p0, %p1172_p3 }
  0x3a   : > { %p1170_p6 = pneg %p1169_p12  ;;  %p1176_p4 = por %p1175_p7, %p1174_p2 }
  0x3c   : > { %p1177_p5 = pnand %p1176_p4, %p1170_p6 }
  0x3e   : > { %1180 = shalt.err (!%p1177_p5)
}
  0x3f   : > { %s1181_s23 = scalar_lea.vmem %s1596_s4, 128  ;;  %s1414_s29 = smov [#allocation2]  }
  0x40   : > { %p1182_p9 = scmp.ne.s32.totalorder %s1596_s4, %s1181_s23  ;;  %s1186_s28 = sshll.u32 %s1414_s29, 4  ;;  %s1187_s28 = int_to_ptr.vmem [resolvable:$false] %s1186_s28 }
  0x41   : > { %s1188_s8 = scalar_lea.vmem %s1187_s28, 256  ;;  %p1189_p11 = scmp.lt.s32.totalorder %s1596_s4, %s1187_s28 }
  0x42   : > { %p1184_p12 = pnand %p1182_p9, %p1168_p10  ;;  %p1190_p0 = scmp.lt.s32.totalorder %s1188_s8, %s1181_s23 }
  0x44   : > { %p1185_p13 = pneg %p1184_p12  ;;  %p1191_p3 = por %p1190_p0, %p1189_p11 }
  0x46   : > { %p1192_p2 = pnand %p1191_p3, %p1185_p13 }
  0x48   : > { %1195 = shalt.err (!%p1192_p2)
}
  0x49   : > { %1041 = dma.hbm_to_vmem [thread:$0]  (!%p1602_p1), %s1594_s22, 128, %s1596_s4, %s325_s5  }
  0x4a   : > { %p1968_p6 = scmp.lt.s32.totalorder %s1412_s19, 5  ;;  %p1969_p7 = scmp.ge.s32.totalorder %s1412_s19, 1 }
  0x4b   : > { %s194_s7 = sadd.s32 1, %s1380_s11  ;;  %p1971_p13 = scmp.eq.s32.totalorder %s1544_s25, 0 }
  0x4c   : > { %p1637_p11 = pnand %p1969_p7, %p1968_p6  ;;  %p201_p4 = scmp.ne.s32.totalorder %s1380_s11, %s1376_s10 }
  0x4d   : > { %s1645_s15 = scalar_select %p1971_p13, %s1380_s11, %s194_s7  }
  0x4e   : > { %p207_p5 = scmp.ne.s32.totalorder %s1376_s10, %s1372_s30  ;;  %s358_s16 = sand.u32 1, %s1380_s11  }
  0x4f   : > { %s947_s21 = sshll.u32 %s1404_s17, 7  ;;  %p1972_p10 = scmp.eq.s32.totalorder %s1412_s19, 0 }
  0x50   : > { %p1973_p12 = scmp.eq.s32.totalorder %s1530_s20, 0  ;;  %s946_s4 = sshll.u32 %s358_s16, 3 }
  0x51   : > { %p203_p9 = por %p201_p4, %p1972_p10  ;;  %s1664_s23 = scalar_lea.hbm %s1925_s6, %s947_s21 }
  0x52   : > { %p1657_p0 = por %p207_p5, %p1973_p12  ;;  %s362_s30 = scalar_lea.vmem [#allocation5], %s946_s4 }
  0x53   : > { %s369_s25 = sshll.u32 %s362_s30, 4  ;;  %p1975_p1 = scmp.lt.s32.totalorder %s1412_s19, 4  ;;  %s1672_s25 = int_to_ptr.vmem [resolvable:$true] %s369_s25 }
  0x54   : > { %s1974_s26 = scalar_select %p1657_p0, 1, 0 }
  0x55   : > { %p1668_p3 = pnand %p1975_p1, %p203_p9  ;;  %s359_s28 = scalar_lea.sflag [#allocation6], %s358_s16 }
  0x56   : > { %s1196_s8 = scalar_lea.hbm %s1664_s23, 128  ;;  %s1201_s4 = scalar_lea.hbm %s1925_s6, 256 }
  0x57   : > { %p1197_p2 = scmp.ne.s32.totalorder %s1664_s23, %s1196_s8  ;;  %p1198_p6 = pneg %p1668_p3 }
  0x58   : > { %p1202_p4 = scmp.lt.u32.totalorder %s1664_s23, %s1925_s6  ;;  %p1203_p5 = scmp.lt.u32.totalorder %s1201_s4, %s1196_s8 }
  0x59   : > { %p1199_p7 = pnand %p1198_p6, %p1197_p2  ;;  %p1205_p9 = scmp.lt.u32.totalorder %s1196_s8, %s1664_s23 }
  0x5a   : > { %p1204_p10 = por %p1203_p5, %p1202_p4 }
  0x5b   : > { %p1200_p13 = pneg %p1199_p7 }
  0x5c   : > { %p1206_p12 = por %p1205_p9, %p1204_p10 }
  0x5e   : > { %p1207_p1 = pnand %p1206_p12, %p1200_p13 }
  0x60   : > { %1210 = shalt.err (!%p1207_p1)
}
  0x61   : > { %s1211_s16 = scalar_lea.vmem %s1672_s25, 128  ;;  %s1415_s30 = smov [#allocation5]  }
  0x62   : > { %p1212_p2 = scmp.ne.s32.totalorder %s1672_s25, %s1211_s16  ;;  %s1216_s7 = sshll.u32 %s1415_s30, 4  ;;  %s1217_s7 = int_to_ptr.vmem [resolvable:$false] %s1216_s7 }
  0x63   : > { %s1218_s21 = scalar_lea.vmem %s1217_s7, 256  ;;  %p1219_p8 = scmp.lt.s32.totalorder %s1672_s25, %s1217_s7 }
  0x64   : > { %p1214_p7 = pnand %p1212_p2, %p1198_p6  ;;  %p1220_p4 = scmp.lt.s32.totalorder %s1218_s21, %s1211_s16 }
  0x66   : > { %p1215_p0 = pneg %p1214_p7  ;;  %p1221_p5 = por %p1220_p4, %p1219_p8 }
  0x68   : > { %p1222_p10 = pnand %p1221_p5, %p1215_p0 }
  0x6a   : > { %1225 = shalt.err (!%p1222_p10)
}
  0x6b   : > { %1044 = dma.hbm_to_vmem [thread:$0]  (!%p1668_p3), %s1664_s23, 128, %s1672_s25, %s359_s28  }
  0x6c   : > { %378 = sbr.rel (%p1637_p11) target bundleno = 783 (0x30f), region = 48  ;;  %s1702_s8 = sand.u32 (!%p1637_p11), 1, %s1388_s13  }
  0x6d   : > { %s1705_s4 = sshll.u32 (!%p1637_p11), %s1702_s8, 3  ;;  %s381_s22 = scalar_lea.sflag (!%p1637_p11), [#allocation3], %s1702_s8 }
  0x6e   : > { %s384_s5 = scalar_lea.vmem (!%p1637_p11), [#allocation2], %s1705_s4  ;;  %p1977_p8 = scmp.ne.s32.totalorder (!%p1637_p11), %s1962_s27, 0 }
  0x73   : > { %1355 = dma.done.wait (%p1977_p8), %s381_s22, 128  }
  0x74   : > { %1357 = vsyncadd (%p1977_p8), %s381_s22, 4294967168  ;;  %s389_s24 = sand.u32 1, %s1376_s10   ;;  %p1978_p11 = scmp.ne.s32.totalorder %s1974_s26, 0 }
  0x75   : > { %s1714_s23 = sshll.u32 %s389_s24, 3  ;;  %s390_s25 = scalar_lea.sflag [#allocation6], %s389_s24 }
  0x76   : > { %1359 = dma.done.wait (%p1978_p11), %s390_s25, 128  }
  0x77   : > { %1361 = vsyncadd (%p1978_p11), %s390_s25, 4294967168  ;;  %v460_v0 = vld [vmem:[%s384_s5] sm:$0xff]  ;;  %vm462_vm0 = vcmask 785408   ;;  %s1979_s2 = sld [smem:[#allocation23_spill]]  ;;  %s1980_s3 = sld [smem:[#allocation24_spill]]  ;;  %v1416_v5 = vmov 0.0  }
  0x78   : > { %v461_v1 = vmul.f32 %v460_v0, %v460_v0  ;;  %996 = vmatprep.subr.bf16.mxu0 %v1416_v5  ;;  %1012 = vmatprep.subr.bf16.mxu1 %v1416_v5  ;;  %vm1417_vm1 = vmmov 0   ;;  %s1981_s1 = sld [smem:[#allocation22_spill]]  ;;  %s1982_s26 = sld [smem:[#allocation16_spill]]  ;;  %vm683_vm4 = vcmask 261120  }
  0x79   : > { %1008 = vmatprep.mubr.msk.bf16.mxu0 %vm1417_vm1, %v1416_v5  ;;  %1024 = vmatprep.mubr.msk.bf16.mxu1 %vm1417_vm1, %v1416_v5  ;;  %s1945_s7 = scalar_lea.vmem [#allocation10], %s1705_s4  ;;  %s1983_s21 = sld [smem:[#allocation17_spill]] }
  0x7a   : > { %v463_v2 = vsel %vm462_vm0, %v461_v1, 0.0  ;;  %s1418_s22 = smov 1   ;;  %s1419_s5 = smov 127  }
  0x7b   : > { %464 = vadd.xlane.f32.xlu0 %v463_v2  ;;  %s1984_s16 = sld [smem:[#allocation25_spill]]  ;;  %s436_s27 = scalar_lea.vmem [#allocation7], %s1705_s4 }
  0x7c   : > { %s712_s28 = sshll.u32 %s436_s27, 4  ;;  %s1788_s28 = int_to_ptr.vmem [resolvable:$true] %s712_s28 }
  0x7d   : > { %v1150_v3 = vld [vmem:[%s1979_s2] sm:$0xff]   ;;  %v1152_v6 = vld [vmem:[%s1979_s2 + $0x8] sm:$0xff]   ;;  %v1154_v8 = vld [vmem:[%s1979_s2 + $0x10] sm:$0xff]  }
  0x7e   : > { %v1151_v4 = vld [vmem:[%s1980_s3] sm:$0xff]   ;;  %997 = vmatpush3.bf16.msra.mxu0 %v1150_v3  ;;  %v1153_v7 = vld [vmem:[%s1980_s3 + $0x8] sm:$0xff]   ;;  %v1155_v9 = vld [vmem:[%s1980_s3 + $0x10] sm:$0xff]   ;;  %p451_p0 = scmp.lt.s32.totalorder %s1982_s26, 1 }
  0x7f   : > { %1013 = vmatpush3.bf16.msra.mxu1 %v1151_v4  ;;  %998 = vmatprep.subr.bf16.mxu0 %v1416_v5  ;;  %v1156_v10 = vld [vmem:[%s1979_s2 + $0x18] sm:$0xff]   ;;  %v1158_v12 = vld [vmem:[%s1979_s2 + $0x20] sm:$0xff]   ;;  %v1160_v14 = vld [vmem:[%s1979_s2 + $0x28] sm:$0xff]   ;;  %s1986_s2 = scalar_lea.vmem [#allocation5], %s1714_s23  ;;  %s687_s23 = scalar_lea.sflag [#allocation4], %s1702_s8 }
  0x80   : > { %1014 = vmatprep.subr.bf16.mxu1 %v1416_v5  ;;  %v1157_v11 = vld [vmem:[%s1980_s3 + $0x18] sm:$0xff]   ;;  %v1159_v13 = vld [vmem:[%s1980_s3 + $0x20] sm:$0xff]   ;;  %v1161_v15 = vld [vmem:[%s1980_s3 + $0x28] sm:$0xff]   ;;  %s452_s24 = scalar_select %p451_p0, %s1982_s26, 1 }
  0x81   : > { %v956_v24 = vld [vmem:[%s1981_s1] ss:$0 sm:$0xff]  ;;  %s974_s1 = sshll.u32 %s1983_s21, 1  ;;  %v675_v39 = vld [vmem:[%s1986_s2] sm:$0xff]  ;;  %s1987_s3 = sld [smem:[#allocation20_spill]] }
  0x82   : > { %999 = vmatpush3.bf16.msra.mxu0 %v1152_v6  ;;  %v484_v25 = vmul.f32 %v956_v24, %v460_v0  ;;  %s954_s25 = sshll.u32 %s452_s24, 3  ;;  %s1420_s2 = smov 32  }
  0x83   : > { %1015 = vmatpush3.bf16.msra.mxu1 %v1153_v7  ;;  %1000 = vmatprep.subr.bf16.mxu0 %v1416_v5  ;;  %s454_s30 = scalar_lea.vmem %s1984_s16, %s954_s25  ;;  %s1421_s21 = smov [#allocation7]  }
  0x84   : > { %1016 = vmatprep.subr.bf16.mxu1 %v1416_v5  ;;  %v666_v37 = vld [vmem:[%s454_s30] sm:$0xff] }
  0x86   : > { %1001 = vmatpush3.bf16.msra.mxu0 %v1154_v8 }
  0x87   : > { %1017 = vmatpush3.bf16.msra.mxu1 %v1155_v9  ;;  %1002 = vmatprep.subr.bf16.mxu0 %v1416_v5  ;;  %p1989_p6 = scmp.ne.s32.totalorder %s1987_s3, 0 }
  0x88   : > { %1018 = vmatprep.subr.bf16.mxu1 %v1416_v5 }
  0x8a   : > { %1003 = vmatpush3.bf16.msra.mxu0 %v1156_v10 }
  0x8b   : > { %1019 = vmatpush3.bf16.msra.mxu1 %v1157_v11  ;;  %1004 = vmatprep.subr.bf16.mxu0 %v1416_v5 }
  0x8c   : > { %1020 = vmatprep.subr.bf16.mxu1 %v1416_v5 }
  0x8e   : > { %1005 = vmatpush3.bf16.msra.mxu0 %v1158_v12 }
  0x8f   : > { %1021 = vmatpush3.bf16.msra.mxu1 %v1159_v13  ;;  %1006 = vmatprep.subr.bf16.mxu0 %v1416_v5 }
  0x90   : > { %1022 = vmatprep.subr.bf16.mxu1 %v1416_v5 }
  0x92   : > { %1007 = vmatpush3.bf16.msra.mxu0 %v1160_v14 }
  0x93   : > { %1023 = vmatpush3.bf16.msra.mxu1 %v1161_v15 }
 0x108   : > { %v465_v16 = vpop.xlane.xlu0 %464 }
 0x109   : > { %v467_v17 = vmul.f32 0.010416667, %v465_v16 }
 0x10b   : > { %1162 = vrsqrt.f32 %v467_v17  ;;  %vm470_vm2 = vcmp.eq.f32.partialorder %v467_v17, inf  ;;  %v473_v20 = vand.u32 2147483648, %v467_v17  ;;  %vm472_vm3 = vcmp.eq.f32.partialorder %v467_v17, 0.0 }
 0x115   : > { %v1163_v18 = vpop.eup %1162 }
 0x116   : > { %v469_v19 = vmul.f32 %v1163_v18, %v467_v17 }
 0x118   : > { %v471_v21 = vsel %vm470_vm2, %v467_v17, %v469_v19 }
 0x119   : > { %v474_v22 = vsel %vm472_vm3, %v473_v20, %v471_v21 }
 0x11a   : > { %v475_v23 = vadd.f32 1e-05, %v474_v22 }
 0x11c   : > { %1164 = vrcp.f32 %v475_v23 }
 0x126   : > { %v1165_v26 = vpop.eup %1164 }
 0x127   : > { %v485_v27 = vmul.f32 %v1165_v26, %v484_v25 }
 0x129   : > { %v486_v28 = vpack.c.bf16 %v485_v27, %v485_v27 }
 0x12b   : > { %1009 = vmatmul.mubr.msk.bf16.vlgmr.msra.gmra.mrb[0].mxu0 %vm462_vm0, %v486_v28  ;;  %1025 = vmatmul.mubr.msk.bf16.vlgmr.msra.gmra.mrb[0].mxu1 %vm462_vm0, %v486_v28 }
 0x1fe   : > { %v572_v29 = vpop.f32.mrb[0].mxu0  ;;  %v660_v30 = vpop.f32.mrb[0].mxu1 }
 0x1ff   : > { %685 = vst.msk [vmem:[%s1945_s7] sm:$0xff] %vm683_vm4, %v660_v30  ;;  %v1026_v31 = vpop.f32.mrb[1].mxu1  ;;  %673 = vrot.lane.b32.xlu1 %v572_v29, %s1418_s22  ;;  %668 = vrot.lane.b32.xlu0 %v572_v29, %s1419_s5  ;;  %v1010_v32 = vpop.f32.mrb[1].mxu0  ;;  %s1985_s22 = sld [smem:[#allocation26_spill]]  ;;  %s708_s5 = sadd.s32 %s1982_s26, %s974_s1  ;;  %v667_v42 = vmul.f32 %v666_v37, %v572_v29 }
 0x200   : > { %v575_v33 = vpop.f32.mrb[2].mxu0  ;;  %v663_v34 = vpop.f32.mrb[2].mxu1  ;;  %s1779_s24 = sshll.u32 %s708_s5, 7  ;;  %s1226_s26 = scalar_lea.vmem %s1788_s28, 128 }
 0x201   : > { %v1011_v35 = vpop.f32.mrb[3].mxu0  ;;  %v1027_v36 = vpop.f32.mrb[3].mxu1  ;;  %p1227_p3 = scmp.ne.s32.totalorder %s1788_s28, %s1226_s26 }
 0x203   : > { %p1228_p13 = pnand %p1227_p3, %p1989_p6 }
 0x205   : > { %s458_s0 = scalar_lea.vmem %s1985_s22, %s954_s25  ;;  %p1229_p9 = pneg %p1228_p13 }
 0x206   : > { %v670_v38 = vld [vmem:[%s458_s0] sm:$0xff]  ;;  %s1988_s0 = sld [smem:[#allocation27_spill]]  ;;  %s1230_s25 = sshll.u32 %s1421_s21, 4  ;;  %s1231_s25 = int_to_ptr.vmem [resolvable:$false] %s1230_s25 }
 0x207   : > { %s1232_s16 = scalar_lea.vmem %s1231_s25, 256  ;;  %p1233_p12 = scmp.lt.s32.totalorder %s1788_s28, %s1231_s25 }
 0x208   : > { %p1234_p1 = scmp.lt.s32.totalorder %s1232_s16, %s1226_s26 }
 0x20a   : > { %p1235_p2 = por %p1234_p1, %p1233_p12 }
 0x20c   : > { %s1786_s1 = scalar_lea.hbm %s1988_s0, %s1779_s24  ;;  %p1236_p7 = pnand %p1235_p2, %p1229_p9 }
 0x271   : > { %v674_v40 = vpop.permute.xlu1 %673  ;;  %v669_v41 = vpop.permute.xlu0 %668 }
 0x272   : > { %v671_v43 = vmul.f32 %v670_v38, %v669_v41  ;;  %v676_v44 = vmul.f32 %v675_v39, %v674_v40 }
 0x274   : > { %v672_v45 = vadd.f32 %v671_v43, %v667_v42 }
 0x276   : > { %v677_v46 = vadd.f32 %v676_v44, %v672_v45 }
 0x278   : > { %680 = vrot.lane.b32.xlu1 %v677_v46, %s1420_s2  ;;  %678 = vst.msk [vmem:[%s436_s27] sm:$0xff] %vm462_vm0, %v677_v46 }
 0x279   : > { %1239 = shalt.err (!%p1236_p7)
}
 0x27a   : > { %s1240_s8 = scalar_lea.hbm %s1786_s1, 128  ;;  %s1244_s5 = scalar_lea.hbm %s1988_s0, 512 }
 0x27b   : > { %p1241_p4 = scmp.ne.s32.totalorder %s1786_s1, %s1240_s8  ;;  %p1245_p8 = scmp.lt.u32.totalorder %s1786_s1, %s1988_s0 }
 0x27c   : > { %p1246_p11 = scmp.lt.u32.totalorder %s1244_s5, %s1240_s8  ;;  %p1248_p3 = scmp.lt.u32.totalorder %s1240_s8, %s1786_s1 }
 0x27d   : > { %p1242_p5 = pnand %p1241_p4, %p1989_p6 }
 0x27e   : > { %p1247_p0 = por %p1246_p11, %p1245_p8 }
 0x27f   : > { %p1243_p10 = pneg %p1242_p5 }
 0x280   : > { %p1249_p13 = por %p1248_p3, %p1247_p0 }
 0x282   : > { %p1250_p9 = pnand %p1249_p13, %p1243_p10 }
 0x284   : > { %1253 = shalt.err (!%p1250_p9)
}
 0x285   : > { %1032 = dma.vmem_to_hbm [thread:$0]  (%p1989_p6), %s1788_s28, 128, %s1786_s1, %s687_s23  }
 0x286   : > { %s691_s7 = sand.u32 1, %s1530_s20   ;;  %s443_s2 = scalar_lea.vmem [#allocation8], %s1705_s4 }
 0x287   : > { %s727_s26 = sshll.u32 %s443_s2, 4  ;;  %s1990_s21 = scalar_lea.vmem [#allocation10], %s1705_s4  ;;  %s1823_s26 = int_to_ptr.vmem [resolvable:$true] %s727_s26 }
 0x288   : > { %s742_s25 = sshll.u32 %s1990_s21, 4  ;;  %s1991_s30 = sld [smem:[#allocation28_spill]]  ;;  %s1831_s25 = int_to_ptr.vmem [resolvable:$true] %s742_s25 }
 0x289   : > { %s1993_s0 = sld [smem:[#allocation29_spill]]  ;;  %s1834_s20 = scalar_lea.sflag [#allocation9], %s691_s7 }
 0x28a   : > { %s1254_s4 = scalar_lea.vmem %s1823_s26, 128  ;;  %s1422_s1 = smov [#allocation8]  }
 0x28b   : > { %p1255_p12 = scmp.ne.s32.totalorder %s1823_s26, %s1254_s4  ;;  %s1258_s23 = sshll.u32 %s1422_s1, 4  ;;  %s1259_s23 = int_to_ptr.vmem [resolvable:$false] %s1258_s23 }
 0x28c   : > { %s1260_s21 = scalar_lea.vmem %s1259_s23, 256  ;;  %p1261_p7 = scmp.lt.s32.totalorder %s1823_s26, %s1259_s23 }
 0x28d   : > { %p1256_p1 = pnand %p1255_p12, %p1989_p6  ;;  %p1262_p4 = scmp.lt.s32.totalorder %s1260_s21, %s1254_s4 }
 0x28e   : > { %s1992_s22 = smov %s1991_s30  ;;  %s1821_s5 = scalar_lea.hbm %s1991_s30, %s1779_s24 }
 0x28f   : > { %s1829_s28 = scalar_lea.hbm %s1993_s0, %s1779_s24  ;;  %p1257_p2 = pneg %p1256_p1 }
 0x290   : > { %p1263_p5 = por %p1262_p4, %p1261_p7 }
 0x292   : > { %p1264_p10 = pnand %p1263_p5, %p1257_p2 }
 0x2ea   : > { %v681_v47 = vpop.permute.xlu1 %680 }
 0x2eb   : > { %684 = vst.msk [vmem:[%s443_s2] sm:$0xff] %vm683_vm4, %v681_v47 }
 0x2ec   : > { %1267 = shalt.err (!%p1264_p10)
}
 0x2ed   : > { %s1268_s24 = scalar_lea.hbm %s1821_s5, 128  ;;  %s1272_s16 = scalar_lea.hbm %s1992_s22, 512 }
 0x2ee   : > { %p1269_p8 = scmp.ne.s32.totalorder %s1821_s5, %s1268_s24  ;;  %p1273_p3 = scmp.lt.u32.totalorder %s1821_s5, %s1992_s22 }
 0x2ef   : > { %p1274_p13 = scmp.lt.u32.totalorder %s1272_s16, %s1268_s24  ;;  %p1276_p12 = scmp.lt.u32.totalorder %s1268_s24, %s1821_s5 }
 0x2f0   : > { %p1270_p11 = pnand %p1269_p8, %p1989_p6 }
 0x2f1   : > { %p1275_p9 = por %p1274_p13, %p1273_p3 }
 0x2f2   : > { %p1271_p0 = pneg %p1270_p11 }
 0x2f3   : > { %p1277_p1 = por %p1276_p12, %p1275_p9 }
 0x2f5   : > { %p1278_p2 = pnand %p1277_p1, %p1271_p0 }
 0x2f7   : > { %1281 = shalt.err (!%p1278_p2)
}
 0x2f8   : > { %1033 = dma.vmem_to_hbm [thread:$0]  (%p1989_p6), %s1823_s26, 128, %s1821_s5, %s1834_s20  }
 0x2f9   : > { %s1282_s27 = scalar_lea.vmem %s1831_s25, 128  ;;  %s1423_s29 = smov [#allocation10]  }
 0x2fa   : > { %p1283_p7 = scmp.ne.s32.totalorder %s1831_s25, %s1282_s27  ;;  %s1286_s4 = sshll.u32 %s1423_s29, 4  ;;  %s1287_s4 = int_to_ptr.vmem [resolvable:$false] %s1286_s4 }
 0x2fb   : > { %s1288_s1 = scalar_lea.vmem %s1287_s4, 256  ;;  %p1289_p10 = scmp.lt.s32.totalorder %s1831_s25, %s1287_s4 }
 0x2fc   : > { %p1284_p4 = pnand %p1283_p7, %p1989_p6  ;;  %p1290_p8 = scmp.lt.s32.totalorder %s1288_s1, %s1282_s27 }
 0x2fe   : > { %p1285_p5 = pneg %p1284_p4  ;;  %p1291_p11 = por %p1290_p8, %p1289_p10 }
 0x300   : > { %p1292_p0 = pnand %p1291_p11, %p1285_p5 }
 0x302   : > { %1295 = shalt.err (!%p1292_p0)
}
 0x303   : > { %s1296_s26 = scalar_lea.hbm %s1829_s28, 128  ;;  %s1300_s21 = scalar_lea.hbm %s1993_s0, 512 }
 0x304   : > { %p1297_p3 = scmp.ne.s32.totalorder %s1829_s28, %s1296_s26  ;;  %p1301_p12 = scmp.lt.u32.totalorder %s1829_s28, %s1993_s0 }
 0x305   : > { %p1302_p1 = scmp.lt.u32.totalorder %s1300_s21, %s1296_s26  ;;  %p1304_p7 = scmp.lt.u32.totalorder %s1296_s26, %s1829_s28 }
 0x306   : > { %p1298_p13 = pnand %p1297_p3, %p1989_p6 }
 0x307   : > { %p1303_p2 = por %p1302_p1, %p1301_p12 }
 0x308   : > { %p1299_p9 = pneg %p1298_p13 }
 0x309   : > { %p1305_p4 = por %p1304_p7, %p1303_p2 }
 0x30b   : > { %p1306_p5 = pnand %p1305_p4, %p1299_p9 }
 0x30d   : > { %1309 = shalt.err (!%p1306_p5)
}
 0x30e   : > { %1034 = dma.vmem_to_hbm [thread:$0]  (%p1989_p6), %s1831_s25, 128, %s1829_s28, %s1834_s20  }
 0x30f PF: > { %s1994_s2 = sld [smem:[#allocation15_spill]]  ;;  %p1056_p10 = scmp.ge.s32.totalorder %s1412_s19, 2 }
 0x310   : > { %p1995_p8 = scmp.ne.s32.totalorder %s1965_s12, 0 }
 0x312   : > { %p1046_p11 = pnand %p1056_p10, %p1995_p8 }
 0x315   : > { %s754_s16 = sand.u32 1, %s1994_s2  }
 0x316   : > { %s755_s8 = scalar_lea.sflag [#allocation4], %s754_s16 }
 0x317   : > { %1363 = dma.done.wait (!%p1046_p11), %s755_s8, 128  }
 0x318   : > { %1365 = vsyncadd (!%p1046_p11), %s755_s8, 4294967168  ;;  %s1996_s30 = sadd.s32 4294967294, %s1412_s19  }
 0x319   : > { %s763_s27 = sand.u32 1, %s1996_s30  }
 0x31a   : > { %s764_s29 = scalar_lea.sflag [#allocation9], %s763_s27 }
 0x31b   : > { %1367 = dma.done.wait (!%p1046_p11), %s764_s29, 256  }
 0x31c   : > { %1369 = vsyncadd (!%p1046_p11), %s764_s29, 4294967040  ;;  %s32_s19 = sadd.s32 1, %s1412_s19   ;;  %s1997_s3 = sld [smem:[#allocation18_spill]] }
 0x31d   : > { %p29_p6 = scmp.ge.s32.totalorder %s32_s19, 6   ;;  %s1998_s25 = sld [smem:[#allocation19_spill]] }
 0x31e   : > { %s1999_s30 = smov %s1376_s10  ;;  %s2000_s10 = smov %s1380_s11 }
 0x31f   : > { %s2001_s11 = smov %s1645_s15  ;;  %s2002_s12 = smov %s1388_s13 }
 0x320   : > { %s2003_s13 = smov %s1392_s14  ;;  %s2004_s14 = smov %s1586_s9 }
 0x321   : > { %s2005_s15 = smov %s1404_s17  ;;  %s2006_s16 = smov %s1408_s18 }
 0x322   : > { %s2007_s17 = smov %s1997_s3  ;;  %31 = sbr.rel (!%p29_p6) target bundleno = 23 (0x17), region = 144 }
 0x323   : > { %s2008_s18 = smov %s1998_s25 }
 0x329   :  { %778 = vsyncpa [#allocation3], 1 }
 0x32a   :  { %780 = vsyncpa [#allocation3 + $0x1], 1 }
 0x32b   :  { %781 = vsyncpa [#allocation6], 1 }
 0x32c   :  { %783 = vsyncpa [#allocation6 + $0x1], 1 }
 0x32d   :  { %784 = vsyncpa [#allocation4], 1 }
 0x32e   :  { %786 = vsyncpa [#allocation4 + $0x1], 1 }
 0x32f   :  { %787 = vsyncpa [#allocation9], 1 }
 0x330   :  { %789 = vsyncpa [#allocation9 + $0x1], 1 }

</bundles_post_ra>
